<compile_context>
chip_gen: v7x
topology: tpu7x:2x2x1
jax: 0.10.0
libtpu: 0.0.40
codegen_flags: <defaults>
</compile_context>

<pallas_src>
import functools

import jax
import jax.numpy as jnp
from jax import lax
from jax.experimental import pallas as pl
from jax.experimental.pallas import tpu as pltpu

# Shapes implied by the module: input [4, 16, 3, 3], conv 16->64 (1x1),
# linear (64*3*3=576) -> 16.
N, C, H, W = 4, 16, 3, 3
K = 64            # conv output channels
O = 16            # linear output features
HW = H * W
CHW = C * HW      # 144


def _flatten_op_kernel(x_ref, w_ref, b_ref, out_ref):
    """Single invocation — everything resident in VMEM.

    x_ref  : (N, C*HW)   flattened input, row-major NCHW order (free reshape)
    w_ref  : (C*HW, O)   folded weight: conv 1x1 weight absorbed into Linear
    b_ref  : (1, O)      effective bias (conv bias folded through Linear)
    out_ref: (N, O)      final output
    """
    out_ref[...] = (
        jnp.dot(x_ref[...], w_ref[...],
                preferred_element_type=jnp.float32,
                precision=lax.Precision.HIGHEST)
        + b_ref[...]
    )


def _precompute_folded_params(conv_w, conv_b, lin_w, lin_b):
    """Input-independent constant fold: do this ONCE, not per forward call."""
    conv_w2d = conv_w.reshape(K, C)                 # (K, C)
    lin_w_r = lin_w.reshape(O, K, HW)               # (O, K, HW)
    # W_eff[c*HW + hw, o] = sum_k conv_w[k, c] * lin_w[o, k*HW + hw]
    w_eff = jnp.einsum("kc,okh->cho", conv_w2d, lin_w_r).reshape(CHW, O)
    # b_eff[o] = lin_b[o] + sum_{k,hw} conv_b[k] * lin_w[o, k*HW + hw]
    b_eff = (lin_b + lin_w_r.sum(axis=-1) @ conv_b).reshape(1, O)
    return w_eff, b_eff


def make_flatten_op_forward(conv_w, conv_b, lin_w, lin_b):
    """Returns a jitted forward closing over the precomputed folded params."""
    w_eff, b_eff = _precompute_folded_params(conv_w, conv_b, lin_w, lin_b)
    w_eff = jax.device_put(w_eff)
    b_eff = jax.device_put(b_eff)

    call = pl.pallas_call(
        _flatten_op_kernel,
        out_shape=jax.ShapeDtypeStruct((N, O), jnp.float32),
        # No grid: single invocation; whole arrays live in VMEM.
        in_specs=[
            pl.BlockSpec(memory_space=pltpu.MemorySpace.VMEM),   # x (N, C*HW)
            pl.BlockSpec(memory_space=pltpu.MemorySpace.VMEM),   # w_eff
            pl.BlockSpec(memory_space=pltpu.MemorySpace.VMEM),   # b_eff
        ],
        out_specs=pl.BlockSpec(memory_space=pltpu.MemorySpace.VMEM),
    )

    @jax.jit
    def forward(x_nchw):
        # Zero-copy row-major reshape: index c*HW + hw matches W_eff rows.
        x_flat = x_nchw.reshape(N, CHW)
        return call(x_flat, w_eff, b_eff)

    return forward


def reference_forward(x_nchw, conv_w, conv_b, lin_w, lin_b):
    """Plain-JAX reference matching the PyTorch forward exactly."""
    step0 = (jnp.einsum("nchw,kc->nkhw", x_nchw, conv_w.reshape(K, C),
                        precision=lax.Precision.HIGHEST)
             + conv_b[None, :, None, None])
    step1 = step0.reshape(N, K * HW)          # flatten(start_dim=1), NCHW order
    return jnp.dot(step1, lin_w.T, precision=lax.Precision.HIGHEST) + lin_b


if __name__ == "__main__":
    key = jax.random.PRNGKey(0)
    k_x, k_w1, k_b1, k_w2, k_b2 = jax.random.split(key, 5)

    # Deterministic parameter init (shapes from the module's __init__).
    x = jax.random.normal(k_x, (N, C, H, W), dtype=jnp.float32)
    conv_w = jax.random.normal(k_w1, (K, C, 1, 1), dtype=jnp.float32) * 0.1
    conv_b = jax.random.normal(k_b1, (K,), dtype=jnp.float32) * 0.1
    lin_w = jax.random.normal(k_w2, (O, K * HW), dtype=jnp.float32) * 0.05
    lin_b = jax.random.normal(k_b2, (O,), dtype=jnp.float32) * 0.05

    forward = make_flatten_op_forward(conv_w, conv_b, lin_w, lin_b)

    out = forward(x)
    out = jax.block_until_ready(out)

    ref = reference_forward(x, conv_w, conv_b, lin_w, lin_b)
    assert out.shape == (N, O)
    assert jnp.allclose(out, ref, rtol=1e-4, atol=1e-4), (
        f"max abs err {jnp.max(jnp.abs(out - ref))}")

    print("KERNEL_OK")
</pallas_src>

<mosaic_0001>
module attributes {stable_mosaic.version = 11 : i64} {
  func.func @_flatten_op_kernel(%arg0: memref<4x144xf32, #tpu.memory_space<vmem>>, %arg1: memref<144x16xf32, #tpu.memory_space<vmem>>, %arg2: memref<1x16xf32, #tpu.memory_space<vmem>>, %arg3: memref<4x16xf32, #tpu.memory_space<vmem>>) attributes {dimension_semantics = [], scalar_prefetch = 0 : i64, scratch_operands = 0 : i64, tpu.core_type = #tpu.core_type<tc>} {
    %c0 = arith.constant 0 : index
    %c0_0 = arith.constant 0 : index
    %0 = vector.load %arg0[%c0, %c0_0] : memref<4x144xf32, #tpu.memory_space<vmem>>, vector<4x144xf32>
    %c0_1 = arith.constant 0 : index
    %c0_2 = arith.constant 0 : index
    %1 = vector.load %arg1[%c0_1, %c0_2] : memref<144x16xf32, #tpu.memory_space<vmem>>, vector<144x16xf32>
    %cst = arith.constant dense<0.000000e+00> : vector<4x16xf32>
    %2 = tpu.matmul %0, %1, %cst {dimension_numbers = #tpu.dot_dimension_numbers<[1], [0], [0], [1], [0, 0, 1, 1], [], []>, precision = #tpu.contract_precision<fp32>} : vector<4x144xf32>, vector<144x16xf32>, vector<4x16xf32> -> vector<4x16xf32>
    %c0_3 = arith.constant 0 : index
    %c0_4 = arith.constant 0 : index
    %3 = vector.load %arg2[%c0_3, %c0_4] : memref<1x16xf32, #tpu.memory_space<vmem>>, vector<1x16xf32>
    %4 = vector.broadcast %3 : vector<1x16xf32> to vector<4x16xf32>
    %5 = arith.addf %2, %4 : vector<4x16xf32>
    %c0_5 = arith.constant 0 : index
    %c0_6 = arith.constant 0 : index
    %6 = vector.load %arg3[%c0_5, %c0_6] : memref<4x16xf32, #tpu.memory_space<vmem>>, vector<4x16xf32>
    tpu.vector_store %arg3[%c0_5, %c0_6], %5 {strides = array<i32>} : memref<4x16xf32, #tpu.memory_space<vmem>>, vector<4x16xf32>,
    return
  }
}

</mosaic_0001>

<bundles_post_ra>
// kernel: forward.1
= control target key start
LH: loop header
LB: loop body
LE: loop exit
PB: predicated region body
PF: predicated region fallthrough
CT: control target
= control target key end

     0   :  { %v942_v3 = vmov 0.0|0.0   ;;  %s1375_s0 = inlined_call_operand.vmem [shape: f32[4,144], index: 0, kind: input, shape index: {}]   ;;  %s1376_s1 = inlined_call_operand.vmem [shape: f32[144,16], index: 1, kind: input, shape index: {}]   ;;  %s1377_s2 = inlined_call_operand.vmem [shape: f32[1,16], index: 2, kind: input, shape index: {}]   ;;  %s1378_s3 = inlined_call_operand.hbm [shape: f32[4,16], index: 3, kind: output, shape index: {}]  }
   0x1   :  { %v16_v0 = vld [vmem:[%s1376_s1] sm:$0xff]  ;;  %v17_v1 = vld [vmem:[%s1376_s1 + $0x8] sm:$0xff]  ;;  %v973_v2 = vld [vmem:[%s1376_s1 + $0x10] sm:$0xff]  ;;  %743 = vmatprep.subr.bf16.mxu1 %v942_v3  ;;  %824 = vmatprep.subr.bf16.mxu0 %v942_v3 }
   0x2   :  { %v47_v4 = vand.u32 4294901760, %v16_v0  ;;  %v50_v5 = vand.u32 4294901760, %v17_v1  ;;  %v980_v6 = vld [vmem:[%s1376_s1 + $0x18] sm:$0xff]  ;;  %v53_v7 = vand.u32 4294901760, %v973_v2  ;;  %v987_v9 = vld [vmem:[%s1376_s1 + $0x20] sm:$0xff]  ;;  %v992_v10 = vld [vmem:[%s1376_s1 + $0x28] sm:$0xff] }
   0x3   :  { %v56_v8 = vand.u32 4294901760, %v980_v6  ;;  %v59_v13 = vand.u32 4294901760, %v987_v9  ;;  %v62_v14 = vand.u32 4294901760, %v992_v10  ;;  %v1011_v15 = vld [vmem:[%s1376_s1 + $0x30] sm:$0xff]  ;;  %v1016_v16 = vld [vmem:[%s1376_s1 + $0x38] sm:$0xff]  ;;  %v15_v17 = vld [vmem:[%s1375_s0] sm:$0xff] }
   0x4   :  { %v994_v11 = vpack.c.bf16 %v50_v5, %v47_v4 }
   0x5   :  { %v1002_v12 = vpack.c.bf16 %v56_v8, %v53_v7 }
   0x6   :  { %745 = vmatpush1.bf16.msra.mxu1 %v994_v11  ;;  %826 = vmatpush1.bf16.msra.mxu0 %v994_v11 }
   0x7   :  { %746 = vmatprep.subr.bf16.mxu1 %v942_v3  ;;  %827 = vmatprep.subr.bf16.mxu0 %v942_v3 }
   0x8   :  { %8 = vsyncpa [#allocation3], 0  ;;  %v1027_v18 = vpack.c.bf16 %v62_v14, %v59_v13  ;;  %v65_v19 = vand.u32 4294901760, %v1011_v15  ;;  %v68_v20 = vand.u32 4294901760, %v1016_v16  ;;  %v1036_v21 = vld [vmem:[%s1376_s1 + $0x40] sm:$0xff]  ;;  %v1041_v22 = vld [vmem:[%s1376_s1 + $0x48] sm:$0xff]  ;;  %v42_v23 = vcombine.high %v15_v17, %v15_v17 }
   0x9   :  { %vm43_vm0 = vcmask 130048   ;;  %v71_v25 = vand.u32 4294901760, %v1036_v21  ;;  %v74_v26 = vand.u32 4294901760, %v1041_v22  ;;  %v1058_v28 = vld [vmem:[%s1376_s1 + $0x50] sm:$0xff]  ;;  %v1063_v29 = vld [vmem:[%s1376_s1 + $0x58] sm:$0xff]  ;;  %v1085_v35 = vld [vmem:[%s1376_s1 + $0x60] sm:$0xff]  ;;  %v1093_v38 = vsub.f32 %v16_v0, %v47_v4 }
   0xa   :  { %748 = vmatpush1.bf16.msra.mxu1 %v1002_v12  ;;  %829 = vmatpush1.bf16.msra.mxu0 %v1002_v12  ;;  %v1049_v24 = vpack.c.bf16 %v68_v20, %v65_v19  ;;  %v44_v27 = vsel %vm43_vm0, %v42_v23, 0  ;;  %v77_v33 = vand.u32 4294901760, %v1058_v28  ;;  %v80_v34 = vand.u32 4294901760, %v1063_v29  ;;  %v1090_v36 = vld [vmem:[%s1376_s1 + $0x68] sm:$0xff]  ;;  %v1113_v45 = vld [vmem:[%s1376_s1 + $0x70] sm:$0xff]  ;;  %v1120_v46 = vld [vmem:[%s1376_s1 + $0x78] sm:$0xff] }
   0xb   :  { %749 = vmatprep.subr.bf16.mxu1 %v942_v3  ;;  %830 = vmatprep.subr.bf16.mxu0 %v942_v3  ;;  %v1065_v30 = vand.u32 4294901760, %v44_v27  ;;  %v1076_v32 = vpack.c.bf16 %v74_v26, %v71_v25  ;;  %v1096_v40 = vand.u32 4294901760, %v15_v17  ;;  %v1098_v41 = vsub.f32 %v17_v1, %v50_v5  ;;  %v1148_v54 = vld [vmem:[%s1376_s1 + $0x80] sm:$0xff]  ;;  %v1153_v55 = vld [vmem:[%s1376_s1 + $0x88] sm:$0xff]  ;;  %s943_s23 = smov [#allocation2]  }
   0xc   :  { %v1106_v42 = vpack.c.bf16 %v80_v34, %v77_v33  ;;  %v83_v43 = vand.u32 4294901760, %v1085_v35  ;;  %v86_v44 = vand.u32 4294901760, %v1090_v36  ;;  %v1125_v48 = vsub.f32 %v973_v2, %v53_v7  ;;  %s734_s24 = sshll.u32 %s943_s23, 4  ;;  %s735_s24 = int_to_ptr.vmem [resolvable:$true] %s734_s24 }
   0xd   :  { %v1068_v31 = vsub.f32 %v44_v27, %v1065_v30  ;;  %v1130_v49 = vsub.f32 %v980_v6, %v56_v8  ;;  %v89_v50 = vand.u32 4294901760, %v1113_v45  ;;  %v1134_v51 = vsub.f32 %v15_v17, %v1096_v40  ;;  %s918_s25 = scalar_lea.vmem %s735_s24, 64  ;;  %p923_p1 = scmp.lt.s32.totalorder %s735_s24, %s735_s24 }
   0xe   :  { %751 = vmatpush1.bf16.msra.mxu1 %v1027_v18  ;;  %832 = vmatpush1.bf16.msra.mxu0 %v1027_v18  ;;  %v1142_v52 = vpack.c.bf16 %v86_v44, %v83_v43  ;;  %v92_v53 = vand.u32 4294901760, %v1120_v46  ;;  %v147_v56 = vand.u32 4294901760, %v1093_v38  ;;  %v154_v57 = vand.u32 4294901760, %v1098_v41  ;;  %p919_p0 = scmp.ne.s32.totalorder %s735_s24, %s918_s25  ;;  %p924_p2 = scmp.lt.s32.totalorder %s918_s25, %s918_s25 }
   0xf   :  { %752 = vmatprep.subr.bf16.mxu1 %v942_v3  ;;  %833 = vmatprep.subr.bf16.mxu0 %v942_v3  ;;  %v130_v37 = vand.u32 4294901760, %v1068_v31  ;;  %v1162_v58 = vsub.f32 %v987_v9, %v59_v13  ;;  %v1167_v59 = vsub.f32 %v992_v10, %v62_v14  ;;  %v95_v60 = vand.u32 4294901760, %v1148_v54 }
  0x10   :  { %v98_v61 = vand.u32 4294901760, %v1153_v55  ;;  %v136_v62 = vand.u32 4294901760, %v1134_v51  ;;  %v161_v63 = vand.u32 4294901760, %v1125_v48  ;;  %v1179_v0 = vpack.c.bf16 %v92_v53, %v89_v50  ;;  %p925_p3 = por %p924_p2, %p923_p1 }
  0x11   :  { %v131_v39 = vsub.f32 %v1068_v31, %v130_v37  ;;  %501 = vmatprep.mubr.f32.mxu0 %v130_v37  ;;  %v148_v1 = vsub.f32 %v1093_v38, %v147_v56  ;;  %v155_v2 = vsub.f32 %v1098_v41, %v154_v57  ;;  %v168_v4 = vand.u32 4294901760, %v1130_v49 }
  0x12   :  { %754 = vmatpush1.bf16.msra.mxu1 %v1049_v24  ;;  %835 = vmatpush1.bf16.msra.mxu0 %v1049_v24  ;;  %v1189_v5 = vsub.f32 %v1011_v15, %v65_v19  ;;  %v1194_v6 = vsub.f32 %v1016_v16, %v68_v20  ;;  %v137_v7 = vsub.f32 %v1134_v51, %v136_v62  ;;  %v175_v9 = vand.u32 4294901760, %v1162_v58  ;;  %p926_p4 = pnand %p925_p3, %p919_p0 }
  0x13   :  { %755 = vmatprep.subr.bf16.mxu1 %v942_v3  ;;  %836 = vmatprep.subr.bf16.mxu0 %v942_v3  ;;  %v132_v47 = vand.u32 4294901760, %v131_v39  ;;  %v162_v8 = vsub.f32 %v1125_v48, %v161_v63  ;;  %v182_v10 = vand.u32 4294901760, %v1167_v59  ;;  %v1206_v13 = vpack.c.bf16 %v98_v61, %v95_v60 }
  0x14   :  { %v149_v14 = vand.u32 4294901760, %v148_v1  ;;  %v156_v15 = vand.u32 4294901760, %v155_v2  ;;  %v169_v16 = vsub.f32 %v1130_v49, %v168_v4  ;;  %v1214_v17 = vsub.f32 %v1036_v21, %v71_v25 }
  0x15   :  { %133 = vmatprep.mubr.f32.mxu1 %v132_v47  ;;  %v1219_v19 = vsub.f32 %v1041_v22, %v74_v26  ;;  %v852_v20 = vpack.c.bf16 %v154_v57, %v147_v56  ;;  %v138_v23 = vand.u32 4294901760, %v137_v7  ;;  %v163_v27 = vand.u32 4294901760, %v162_v8 }
  0x16   :  { %757 = vmatpush1.bf16.msra.mxu1 %v1076_v32  ;;  %838 = vmatpush1.bf16.msra.mxu0 %v1076_v32  ;;  %v176_v37 = vsub.f32 %v1162_v58, %v175_v9  ;;  %v183_v39 = vsub.f32 %v1167_v59, %v182_v10  ;;  %v771_v47 = vpack.c.bf16 %v156_v15, %v149_v14  ;;  %v170_v1 = vand.u32 4294901760, %v169_v16 }
  0x17   :  { %758 = vmatprep.subr.bf16.mxu1 %v942_v3  ;;  %839 = vmatprep.subr.bf16.mxu0 %v942_v3  ;;  %v189_v21 = vand.u32 4294901760, %v1189_v5  ;;  %v196_v25 = vand.u32 4294901760, %v1194_v6  ;;  %v1232_v22 = vsub.f32 %v1058_v28, %v77_v33  ;;  %v1237_v26 = vsub.f32 %v1063_v29, %v80_v34 }
  0x18   :  { %v855_v56 = vpack.c.bf16 %v168_v4, %v161_v63  ;;  %v177_v57 = vand.u32 4294901760, %v176_v37  ;;  %v184_v2 = vand.u32 4294901760, %v183_v39  ;;  %v203_v7 = vand.u32 4294901760, %v1214_v17 }
  0x19   :  { %v774_v8 = vpack.c.bf16 %v170_v1, %v163_v27  ;;  %v190_v14 = vsub.f32 %v1189_v5, %v189_v21  ;;  %v197_v28 = vsub.f32 %v1194_v6, %v196_v25  ;;  %v210_v33 = vand.u32 4294901760, %v1219_v19 }
  0x1a   :  { %760 = vmatpush1.bf16.msra.mxu1 %v1106_v42  ;;  %841 = vmatpush1.bf16.msra.mxu0 %v1106_v42  ;;  %v1248_v29 = vsub.f32 %v1085_v35, %v83_v43  ;;  %v1253_v34 = vsub.f32 %v1090_v36, %v86_v44  ;;  %v858_v63 = vpack.c.bf16 %v182_v10, %v175_v9  ;;  %v217_v15 = vand.u32 4294901760, %v1232_v22 }
  0x1b   :  { %761 = vmatprep.subr.bf16.mxu1 %v942_v3  ;;  %842 = vmatprep.subr.bf16.mxu0 %v942_v3  ;;  %v204_v4 = vsub.f32 %v1214_v17, %v203_v7  ;;  %v191_v16 = vand.u32 4294901760, %v190_v14  ;;  %v198_v35 = vand.u32 4294901760, %v197_v28  ;;  %v211_v43 = vsub.f32 %v1219_v19, %v210_v33 }
  0x1c   :  { %v1266_v36 = vsub.f32 %v1113_v45, %v89_v50  ;;  %v1271_v44 = vsub.f32 %v1120_v46, %v92_v53  ;;  %v861_v9 = vpack.c.bf16 %v196_v25, %v189_v21  ;;  %v231_v27 = vand.u32 4294901760, %v1248_v29 }
  0x1d   :  { %v205_v10 = vand.u32 4294901760, %v204_v4  ;;  %v780_v37 = vpack.c.bf16 %v198_v35, %v191_v16  ;;  %v212_v39 = vand.u32 4294901760, %v211_v43  ;;  %v238_v45 = vand.u32 4294901760, %v1253_v34 }
  0x1e   :  { %763 = vmatpush1.bf16.msra.mxu1 %v1142_v52  ;;  %844 = vmatpush1.bf16.msra.mxu0 %v1142_v52  ;;  %v1282_v46 = vsub.f32 %v1148_v54, %v95_v60  ;;  %v1287_v50 = vsub.f32 %v1153_v55, %v98_v61  ;;  %v864_v53 = vpack.c.bf16 %v210_v33, %v203_v7  ;;  %v245_v25 = vand.u32 4294901760, %v1266_v36 }
  0x1f   :  { %764 = vmatprep.subr.bf16.mxu1 %v942_v3  ;;  %845 = vmatprep.subr.bf16.mxu0 %v942_v3  ;;  %v232_v21 = vsub.f32 %v1248_v29, %v231_v27  ;;  %v252_v54 = vand.u32 4294901760, %v1271_v44  ;;  %vm726_vm1 = vcmask 125952  }
  0x20   :  { %v246_v61 = vsub.f32 %v1266_v36, %v245_v25  ;;  %v259_v7 = vand.u32 4294901760, %v1282_v46  ;;  %v266_v33 = vand.u32 4294901760, %v1287_v50 }
  0x21   :  { %v233_v60 = vand.u32 4294901760, %v232_v21  ;;  %v253_v28 = vsub.f32 %v1271_v44, %v252_v54 }
  0x22   :  { %766 = vmatpush1.bf16.msra.mxu1 %v1179_v0  ;;  %847 = vmatpush1.bf16.msra.mxu0 %v1179_v0  ;;  %v260_v16 = vsub.f32 %v1282_v46, %v259_v7  ;;  %v267_v35 = vsub.f32 %v1287_v50, %v266_v33 }
  0x23   :  { %767 = vmatprep.subr.bf16.mxu1 %v942_v3  ;;  %848 = vmatprep.subr.bf16.mxu0 %v942_v3 }
  0x26   :  { %769 = vmatpush1.bf16.msra.mxu1 %v1206_v13  ;;  %850 = vmatpush1.bf16.msra.mxu0 %v1206_v13 }
  0x27   :  { %770 = vmatprep.subr.bf16.mxu1 %v942_v3  ;;  %851 = vmatprep.subr.bf16.mxu0 %v942_v3 }
  0x29   :  { %139 = vmatmul.mubr.f32.vlgmr.msra.gmra.mrb[0].mxu1 %v138_v23  ;;  %505 = vmatmul.mubr.f32.vlgmr.msra.gmra.mrb[0].mxu0 %v136_v62  ;;  %v777_v62 = vpack.c.bf16 %v184_v2, %v177_v57  ;;  %v218_v23 = vsub.f32 %v1232_v22, %v217_v15  ;;  %v239_v2 = vsub.f32 %v1253_v34, %v238_v45 }
  0x2a   :  { %772 = vmatpush1.bf16.msra.mxu1 %v771_v47  ;;  %853 = vmatpush1.bf16.msra.mxu0 %v852_v20  ;;  %v224_v20 = vand.u32 4294901760, %v1237_v26 }
  0x2b   :  { %773 = vmatprep.subr.bf16.mxu1 %v942_v3  ;;  %854 = vmatprep.subr.bf16.mxu0 %v942_v3  ;;  %v219_v1 = vand.u32 4294901760, %v218_v23  ;;  %v240_v14 = vand.u32 4294901760, %v239_v2 }
  0x2c   :  { %299 = vmatprep.mubr.f32.mxu1 %v1065_v30  ;;  %629 = vmatprep.mubr.f32.mxu0 %v1065_v30  ;;  %v225_v47 = vsub.f32 %v1237_v26, %v224_v20  ;;  %v867_v55 = vpack.c.bf16 %v224_v20, %v217_v15  ;;  %v254_v15 = vand.u32 4294901760, %v253_v28  ;;  %v873_v20 = vpack.c.bf16 %v252_v54, %v245_v25 }
  0x2d   :  { %v789_v4 = vpack.c.bf16 %v240_v14, %v233_v60 }
  0x2e   :  { %775 = vmatpush1.bf16.msra.mxu1 %v774_v8  ;;  %856 = vmatpush1.bf16.msra.mxu0 %v855_v56  ;;  %v783_v56 = vpack.c.bf16 %v212_v39, %v205_v10  ;;  %v226_v57 = vand.u32 4294901760, %v225_v47  ;;  %v268_v10 = vand.u32 4294901760, %v267_v35  ;;  %v801_v39 = vpack.c.bf16 %v1130_v49, %v1125_v48 }
  0x2f   :  { %776 = vmatprep.subr.bf16.mxu1 %v942_v3  ;;  %857 = vmatprep.subr.bf16.mxu0 %v942_v3 }
  0x30   :  { %v786_v8 = vpack.c.bf16 %v226_v57, %v219_v1 }
  0x32   :  { %778 = vmatpush1.bf16.msra.mxu1 %v777_v62  ;;  %859 = vmatpush1.bf16.msra.mxu0 %v858_v63  ;;  %v870_v62 = vpack.c.bf16 %v238_v45, %v231_v27  ;;  %v247_v63 = vand.u32 4294901760, %v246_v61  ;;  %v876_v27 = vpack.c.bf16 %v266_v33, %v259_v7 }
  0x33   :  { %779 = vmatprep.subr.bf16.mxu1 %v942_v3  ;;  %860 = vmatprep.subr.bf16.mxu0 %v942_v3 }
  0x34   :  { %v792_v43 = vpack.c.bf16 %v254_v15, %v247_v63 }
  0x36   :  { %781 = vmatpush1.bf16.msra.mxu1 %v780_v37  ;;  %862 = vmatpush1.bf16.msra.mxu0 %v861_v9  ;;  %v261_v9 = vand.u32 4294901760, %v260_v16  ;;  %v798_v37 = vpack.c.bf16 %v1098_v41, %v1093_v38  ;;  %v804_v38 = vpack.c.bf16 %v1167_v59, %v1162_v58 }
  0x37   :  { %782 = vmatprep.subr.bf16.mxu1 %v942_v3  ;;  %863 = vmatprep.subr.bf16.mxu0 %v942_v3 }
  0x38   :  { %v795_v23 = vpack.c.bf16 %v268_v10, %v261_v9 }
  0x3a   :  { %784 = vmatpush1.bf16.msra.mxu1 %v783_v56  ;;  %865 = vmatpush1.bf16.msra.mxu0 %v864_v53 }
  0x3b   :  { %785 = vmatprep.subr.bf16.mxu1 %v942_v3  ;;  %866 = vmatprep.subr.bf16.mxu0 %v942_v3 }
  0x3e   :  { %787 = vmatpush1.bf16.msra.mxu1 %v786_v8  ;;  %868 = vmatpush1.bf16.msra.mxu0 %v867_v55 }
  0x3f   :  { %788 = vmatprep.subr.bf16.mxu1 %v942_v3  ;;  %869 = vmatprep.subr.bf16.mxu0 %v942_v3 }
  0x42   :  { %790 = vmatpush1.bf16.msra.mxu1 %v789_v4  ;;  %871 = vmatpush1.bf16.msra.mxu0 %v870_v62 }
  0x43   :  { %791 = vmatprep.subr.bf16.mxu1 %v942_v3  ;;  %872 = vmatprep.subr.bf16.mxu0 %v942_v3 }
  0x46   :  { %793 = vmatpush1.bf16.msra.mxu1 %v792_v43  ;;  %874 = vmatpush1.bf16.msra.mxu0 %v873_v20 }
  0x47   :  { %794 = vmatprep.subr.bf16.mxu1 %v942_v3  ;;  %875 = vmatprep.subr.bf16.mxu0 %v942_v3 }
  0x4a   :  { %796 = vmatpush1.bf16.msra.mxu1 %v795_v23  ;;  %877 = vmatpush1.bf16.msra.mxu0 %v876_v27 }
  0x4b   :  { %797 = vmatprep.subr.bf16.mxu1 %v942_v3  ;;  %878 = vmatprep.subr.bf16.mxu0 %v942_v3 }
  0x4d   :  { %301 = vmatmul.mubr.f32.vlgmr.msra.gmra.mrb[0].mxu1 %v1096_v40  ;;  %631 = vmatmul.mubr.f32.vlgmr.msra.gmra.mrb[0].mxu0 %v1096_v40 }
  0x4e   :  { %799 = vmatpush1.bf16.msra.mxu1 %v798_v37  ;;  %880 = vmatpush1.bf16.msra.mxu0 %v994_v11  ;;  %v807_v11 = vpack.c.bf16 %v1194_v6, %v1189_v5 }
  0x4f   :  { %800 = vmatprep.subr.bf16.mxu1 %v942_v3  ;;  %881 = vmatprep.subr.bf16.mxu0 %v942_v3 }
  0x50   :  { %408 = vmatprep.mubr.f32.mxu1 %v1068_v31  ;;  %719 = vmatprep.mubr.f32.mxu0 %v1065_v30  ;;  %v819_v30 = vpack.c.bf16 %v1271_v44, %v1266_v36  ;;  %v822_v31 = vpack.c.bf16 %v1287_v50, %v1282_v46 }
  0x52   :  { %802 = vmatpush1.bf16.msra.mxu1 %v801_v39  ;;  %883 = vmatpush1.bf16.msra.mxu0 %v1002_v12  ;;  %v810_v12 = vpack.c.bf16 %v1219_v19, %v1214_v17 }
  0x53   :  { %803 = vmatprep.subr.bf16.mxu1 %v942_v3  ;;  %884 = vmatprep.subr.bf16.mxu0 %v942_v3 }
  0x56   :  { %805 = vmatpush1.bf16.msra.mxu1 %v804_v38  ;;  %886 = vmatpush1.bf16.msra.mxu0 %v1027_v18  ;;  %v813_v18 = vpack.c.bf16 %v1237_v26, %v1232_v22 }
  0x57   :  { %806 = vmatprep.subr.bf16.mxu1 %v942_v3  ;;  %887 = vmatprep.subr.bf16.mxu0 %v942_v3 }
  0x5a   :  { %808 = vmatpush1.bf16.msra.mxu1 %v807_v11  ;;  %889 = vmatpush1.bf16.msra.mxu0 %v1049_v24  ;;  %v816_v24 = vpack.c.bf16 %v1253_v34, %v1248_v29 }
  0x5b   :  { %809 = vmatprep.subr.bf16.mxu1 %v942_v3  ;;  %890 = vmatprep.subr.bf16.mxu0 %v942_v3 }
  0x5e   :  { %811 = vmatpush1.bf16.msra.mxu1 %v810_v12  ;;  %892 = vmatpush1.bf16.msra.mxu0 %v1076_v32  ;;  %v742_v32 = vld [vmem:[%s1377_s2] ss:$0 sm:$0xff] }
  0x5f   :  { %812 = vmatprep.subr.bf16.mxu1 %v942_v3  ;;  %893 = vmatprep.subr.bf16.mxu0 %v942_v3 }
  0x62   :  { %814 = vmatpush1.bf16.msra.mxu1 %v813_v18  ;;  %895 = vmatpush1.bf16.msra.mxu0 %v1106_v42 }
  0x63   :  { %815 = vmatprep.subr.bf16.mxu1 %v942_v3  ;;  %896 = vmatprep.subr.bf16.mxu0 %v942_v3 }
  0x66   :  { %817 = vmatpush1.bf16.msra.mxu1 %v816_v24  ;;  %898 = vmatpush1.bf16.msra.mxu0 %v1142_v52 }
  0x67   :  { %818 = vmatprep.subr.bf16.mxu1 %v942_v3  ;;  %899 = vmatprep.subr.bf16.mxu0 %v942_v3 }
  0x6a   :  { %820 = vmatpush1.bf16.msra.mxu1 %v819_v30  ;;  %901 = vmatpush1.bf16.msra.mxu0 %v1179_v0 }
  0x6b   :  { %821 = vmatprep.subr.bf16.mxu1 %v942_v3  ;;  %902 = vmatprep.subr.bf16.mxu0 %v942_v3 }
  0x6e   :  { %823 = vmatpush1.bf16.msra.mxu1 %v822_v31  ;;  %904 = vmatpush1.bf16.msra.mxu0 %v1206_v13 }
  0x71   :  { %411 = vmatmul.mubr.f32.vlgmr.msra.gmra.mrb[0].mxu1 %v1134_v51  ;;  %721 = vmatmul.mubr.f32.vlgmr.msra.gmra.mrb[0].mxu0 %v1096_v40 }
 0x144   :  { %v412_v41 = vpop.f32.mrb[0].mxu1  ;;  %v722_v42 = vpop.f32.mrb[0].mxu0 }
 0x145   :  { %v905_v48 = vadd.f32 %v742_v32, %v412_v41  ;;  %v414_v49 = vpop.f32.mrb[1].mxu1  ;;  %v724_v52 = vpop.f32.mrb[1].mxu0 }
 0x147   :  { %v906_v3 = vadd.f32 %v905_v48, %v722_v42 }
 0x149   :  { %727 = vst.msk [vmem:[#allocation2] sm:$0xf] %vm726_vm1, %v906_v3 }
 0x14a   :  { %929 = shalt.err (!%p926_p4)
}
 0x14b   :  { %s930_s27 = scalar_lea.hbm %s1378_s3, 64 }
 0x14c   :  { %p931_p5 = scmp.ne.s32.totalorder %s1378_s3, %s930_s27  ;;  %p934_p6 = scmp.lt.u32.totalorder %s930_s27, %s1378_s3 }
 0x14e   :  { %p936_p7 = pnand %p934_p6, %p931_p5 }
 0x150   :  { %939 = shalt.err (!%p936_p7)
}
 0x151   :  { %737 = dma.vmem_to_hbm [thread:$0]  %s735_s24, 64, %s1378_s3, [#allocation3]  }
 0x152   :  { %940 = dma.done.wait [#allocation3], 64  }
 0x153   :  { %941 = vsyncadd [#allocation3], 4294967232 }
 0x154   :  { %741 = vsyncpa [#allocation3], 1 }

</bundles_post_ra>
